<compile_context>
chip_gen: v7x
topology: tpu7x:2x2x1
jax: 0.10.0
libtpu: 0.0.40
codegen_flags: <defaults>
</compile_context>

<pallas_src>
import jax
import jax.numpy as jnp
from jax.experimental import pallas as pl
from jax.experimental.pallas import tpu as pltpu

_LANES = 128  # lane width; hidden dims (<=128) are zero-padded up to this


def _round_up(x, m):
    return ((x + m - 1) // m) * m


# ---------------------------------------------------------------------------
# Kernel
# ---------------------------------------------------------------------------
def _make_critic_kernel(in_pad):
    """Build the kernel for a given (16-aligned) padded input-feature count."""
    s2 = in_pad  # row offset of W2 inside the bf16 weight slab

    def kernel(x_ref, w_ref, b_ref, o_ref):
        # x tile: (B_TILE, in_pad) -> bf16 for the MXU (no-op if already bf16).
        xb = x_ref[...].astype(jnp.bfloat16)

        # Static, 16-row-aligned slices of the resident parameter slabs.
        w1 = w_ref[0:in_pad, :]          # (in_pad, 128) bf16
        w2 = w_ref[s2:s2 + _LANES, :]    # (128, 128)    bf16
        b1 = b_ref[0:1, :]               # (1, 128) f32
        b2 = b_ref[1:2, :]               # (1, 128) f32
        b3 = b_ref[2:3, 0:1]             # (1, 1)   f32
        w3 = b_ref[3:4, :]               # (1, 128) f32  (w3^T lives in the f32 slab)

        # Layer 1: MXU matmul (bf16 in, f32 acc); f32 bias + ReLU on the VPU.
        h1 = jnp.dot(xb, w1, preferred_element_type=jnp.float32)   # (B_TILE, 128)
        h1 = jnp.maximum(h1 + b1, 0.0)

        # Layer 2.
        h2 = jnp.dot(h1.astype(jnp.bfloat16), w2,
                     preferred_element_type=jnp.float32)           # (B_TILE, 128)
        h2 = jnp.maximum(h2 + b2, 0.0)

        # Output layer (out_features = 1): skip the MXU -- elementwise multiply (VPU)
        # + lane reduction (XLU). Padded lanes of h2 and w3 are zero, so they do not
        # contribute to the sum.
        v = jnp.sum(h2 * w3, axis=-1, keepdims=True)               # (B_TILE, 1) f32
        o_ref[...] = v + b3

    return kernel


# ---------------------------------------------------------------------------
# Parameter packing (done once, outside the hot path)
# ---------------------------------------------------------------------------
def pack_critic_params(params):
    """Pack (w1,b1,w2,b2,w3,b3) into one bf16 weight slab + one f32 bias/w3 slab.

    Weight slab (in_pad + 128, 128) bf16, zero padded:
        rows [0, in_pad)            : w1  (in_dim, h1)
        rows [in_pad, in_pad + 128) : w2  (h1, h2)   (first h1 rows used)
    Bias slab (8, 128) f32:
        row 0 = b1, row 1 = b2, row 2 lane 0 = b3, row 3 lanes [0, h2) = w3^T.
    """
    w1, b1, w2, b2, w3, b3 = (params[k] for k in ("w1", "b1", "w2", "b2", "w3", "b3"))
    in_dim, h1 = w1.shape
    h2 = w2.shape[1]
    if h1 > _LANES or h2 > _LANES:
        raise ValueError("hidden dims must be <= 128 for this packing")

    in_pad = _round_up(in_dim, 16)      # bf16 sublane-tile aligned sections
    rows = in_pad + _LANES

    w = jnp.zeros((rows, _LANES), jnp.float32)
    w = w.at[:in_dim, :h1].set(w1)
    w = w.at[in_pad:in_pad + h1, :h2].set(w2)
    w = w.astype(jnp.bfloat16)

    b = jnp.zeros((8, _LANES), jnp.float32)
    b = b.at[0, :h1].set(b1.reshape(-1))
    b = b.at[1, :h2].set(b2.reshape(-1))
    b = b.at[2, 0].set(b3.reshape(()))
    b = b.at[3, :h2].set(w3[:, 0])      # w3 kept f32 -> clean vld, no packed-row extract
    return w, b


# ---------------------------------------------------------------------------
# Forward wrapper
# ---------------------------------------------------------------------------
def critic_forward(state, w_slab, b_slab, *, block_b=4096):
    """state: (B, in_dim) f32 or bf16. Slabs from pack_critic_params. Returns (B, 1) f32."""
    B, in_dim = state.shape
    in_pad = _round_up(in_dim, 16)
    if w_slab.shape != (in_pad + _LANES, _LANES) or b_slab.shape != (8, _LANES):
        raise ValueError("packed parameter slabs do not match state feature dim")

    # Batch tile: multiple of 8 sublanes. Large by default (per-step overhead dominates
    # at these model sizes), but capped so that when the batch allows >= 2 tiles the
    # grid has >= 2 steps -- the "parallel" axis then spans both v7x TensorCores.
    b8 = _round_up(B, 8)
    bt = min(block_b, b8)
    if b8 > 8:
        bt = min(bt, _round_up((b8 + 1) // 2, 8))
    b_pad = _round_up(B, bt)

    x = state
    if b_pad != B or in_pad != in_dim:
        x = jnp.pad(state, ((0, b_pad - B), (0, in_pad - in_dim)))

    # VMEM budget: x (double-buffered) + out (double-buffered) + resident slabs.
    # Only override the 32 MiB scoped default when actually needed; stay under the
    # v7x 64 MiB physical ceiling.
    x_bytes = bt * in_pad * x.dtype.itemsize
    vmem_needed = 2 * x_bytes + 2 * (bt * 4) + w_slab.size * 2 + b_slab.size * 4 + (1 << 20)
    vmem_limit = None
    if vmem_needed > (32 << 20):
        vmem_limit = min(_round_up(vmem_needed, 1 << 20), 56 << 20)

    out = pl.pallas_call(
        _make_critic_kernel(in_pad),
        out_shape=jax.ShapeDtypeStruct((b_pad, 1), jnp.float32),
        grid=(b_pad // bt,),
        in_specs=[
            pl.BlockSpec((bt, in_pad), lambda i: (i, 0)),    # x: tiled over batch
            pl.BlockSpec(w_slab.shape, lambda i: (0, 0)),    # weights: resident in VMEM
            pl.BlockSpec(b_slab.shape, lambda i: (0, 0)),    # biases + w3: resident
        ],
        out_specs=pl.BlockSpec((bt, 1), lambda i: (i, 0)),
        compiler_params=pltpu.CompilerParams(
            dimension_semantics=("parallel",),               # shard batch over v7x's 2 TCs
            vmem_limit_bytes=vmem_limit,
        ),
    )(x, w_slab, b_slab)

    return out[:B]


# ---------------------------------------------------------------------------
# Init + pure-JAX references
# ---------------------------------------------------------------------------
def init_critic_params(key, in_dim, hidden_dim1=64, hidden_dim2=64):
    """Deterministic synthetic init (PyTorch-Linear-like uniform bounds)."""
    ks = jax.random.split(key, 6)

    def linear(kw, kb, fan_in, fan_out):
        bound = 1.0 / jnp.sqrt(jnp.float32(fan_in))
        # Stored as (fan_in, fan_out) so the math is x @ W.
        w = jax.random.uniform(kw, (fan_in, fan_out), jnp.float32, -bound, bound)
        b = jax.random.uniform(kb, (1, fan_out), jnp.float32, -bound, bound)
        return w, b

    w1, b1 = linear(ks[0], ks[1], in_dim, hidden_dim1)
    w2, b2 = linear(ks[2], ks[3], hidden_dim1, hidden_dim2)
    w3, b3 = linear(ks[4], ks[5], hidden_dim2, 1)
    return {"w1": w1, "b1": b1, "w2": w2, "b2": b2, "w3": w3, "b3": b3}


def critic_reference(state, params):
    """Full-f32 reference matching the PyTorch forward."""
    x = jnp.maximum(state @ params["w1"] + params["b1"], 0.0)
    x = jnp.maximum(x @ params["w2"] + params["b2"], 0.0)
    return x @ params["w3"] + params["b3"]


def critic_reference_bf16(state, params):
    """Reference emulating the kernel's bf16-operand / f32-accumulation arithmetic."""
    bf = lambda a: a.astype(jnp.bfloat16)
    x = jnp.dot(bf(state), bf(params["w1"]), preferred_element_type=jnp.float32)
    x = jnp.maximum(x + params["b1"], 0.0)
    x = jnp.dot(bf(x), bf(params["w2"]), preferred_element_type=jnp.float32)
    x = jnp.maximum(x + params["b2"], 0.0)
    return x @ params["w3"] + params["b3"]   # final layer stays f32 in the kernel too


# ---------------------------------------------------------------------------
# Demo / self-test
# ---------------------------------------------------------------------------
if __name__ == "__main__":
    key = jax.random.PRNGKey(0)
    k_state, k_params, k_state2, k_params2 = jax.random.split(key, 4)

    # Small shapes consistent with the module: batch=8, in_dim=32, hidden 64/64.
    B, in_dim = 8, 32
    state = jax.random.normal(k_state, (B, in_dim), jnp.float32)
    params = init_critic_params(k_params, in_dim, hidden_dim1=64, hidden_dim2=64)
    w_slab, b_slab = pack_critic_params(params)

    fwd = jax.jit(critic_forward)
    value = jax.block_until_ready(fwd(state, w_slab, b_slab))
    assert value.shape == (B, 1), value.shape

    ref_bf16 = critic_reference_bf16(state, params)
    ref_f32 = critic_reference(state, params)
    assert jnp.allclose(value, ref_bf16, atol=1e-3, rtol=1e-3), "mismatch vs bf16 reference"
    assert jnp.allclose(value, ref_f32, atol=5e-2, rtol=5e-2), "mismatch vs f32 reference"

    # Second shape: non-aligned batch / feature dims exercise the padding paths and
    # the >=2-grid-step (dual-TC) tiling path.
    B2, in_dim2 = 200, 20
    state2 = jax.random.normal(k_state2, (B2, in_dim2), jnp.float32)
    params2 = init_critic_params(k_params2, in_dim2)
    w_slab2, b_slab2 = pack_critic_params(params2)
    value2 = jax.block_until_ready(critic_forward(state2, w_slab2, b_slab2))
    assert value2.shape == (B2, 1), value2.shape
    assert jnp.allclose(value2, critic_reference_bf16(state2, params2),
                        atol=1e-3, rtol=1e-3), "mismatch vs bf16 reference (case 2)"

    print("KERNEL_OK")
</pallas_src>

<mosaic_0001>
module attributes {stable_mosaic.version = 11 : i64} {
  func.func @kernel(%arg0: i32, %arg1: memref<8x32xf32, #tpu.memory_space<vmem>>, %arg2: memref<160x128xbf16, #tpu.memory_space<vmem>>, %arg3: memref<8x128xf32, #tpu.memory_space<vmem>>, %arg4: memref<8x1xf32, #tpu.memory_space<vmem>>) attributes {dimension_semantics = [#tpu.dimension_semantics<parallel>], iteration_bounds = array<i64: 1>, scalar_prefetch = 0 : i64, scratch_operands = 0 : i64, tpu.core_type = #tpu.core_type<tc>, window_params = [{transform_indices = @transform_0, window_bounds = array<i64: 8, 32>}, {pipeline_mode = #tpu.pipeline_mode<synchronous>, transform_indices = @transform_1, window_bounds = array<i64: 160, 128>}, {pipeline_mode = #tpu.pipeline_mode<synchronous>, transform_indices = @transform_2, window_bounds = array<i64: 8, 128>}, {transform_indices = @transform_3, window_bounds = array<i64: 8, 1>}]} {
    %c0 = arith.constant 0 : index
    %c0_0 = arith.constant 0 : index
    %0 = vector.load %arg1[%c0, %c0_0] : memref<8x32xf32, #tpu.memory_space<vmem>>, vector<8x32xf32>
    %1 = arith.truncf %0 : vector<8x32xf32> to vector<8x32xbf16>
    %c0_1 = arith.constant 0 : index
    %c0_2 = arith.constant 0 : index
    %2 = vector.load %arg2[%c0_1, %c0_2] : memref<160x128xbf16, #tpu.memory_space<vmem>>, vector<32x128xbf16>
    %c32 = arith.constant 32 : index
    %c0_3 = arith.constant 0 : index
    %3 = vector.load %arg2[%c32, %c0_3] : memref<160x128xbf16, #tpu.memory_space<vmem>>, vector<128x128xbf16>
    %c0_4 = arith.constant 0 : index
    %c0_5 = arith.constant 0 : index
    %4 = vector.load %arg3[%c0_4, %c0_5] : memref<8x128xf32, #tpu.memory_space<vmem>>, vector<1x128xf32>
    %c1 = arith.constant 1 : index
    %c0_6 = arith.constant 0 : index
    %5 = vector.load %arg3[%c1, %c0_6] : memref<8x128xf32, #tpu.memory_space<vmem>>, vector<1x128xf32>
    %c2 = arith.constant 2 : index
    %c0_7 = arith.constant 0 : index
    %6 = vector.load %arg3[%c2, %c0_7] : memref<8x128xf32, #tpu.memory_space<vmem>>, vector<1x1xf32>
    %c3 = arith.constant 3 : index
    %c0_8 = arith.constant 0 : index
    %7 = vector.load %arg3[%c3, %c0_8] : memref<8x128xf32, #tpu.memory_space<vmem>>, vector<1x128xf32>
    %cst = arith.constant dense<0.000000e+00> : vector<8x128xf32>
    %8 = tpu.matmul %1, %2, %cst {dimension_numbers = #tpu.dot_dimension_numbers<[1], [0], [0], [1], [0, 0, 1, 1], [], []>} : vector<8x32xbf16>, vector<32x128xbf16>, vector<8x128xf32> -> vector<8x128xf32>
    %9 = vector.broadcast %4 : vector<1x128xf32> to vector<8x128xf32>
    %10 = arith.addf %8, %9 : vector<8x128xf32>
    %cst_9 = arith.constant 0.000000e+00 : f32
    %11 = vector.broadcast %cst_9 : f32 to vector<8x128xf32>
    %12 = arith.maximumf %10, %11 : vector<8x128xf32>
    %13 = arith.truncf %12 : vector<8x128xf32> to vector<8x128xbf16>
    %cst_10 = arith.constant dense<0.000000e+00> : vector<8x128xf32>
    %14 = tpu.matmul %13, %3, %cst_10 {dimension_numbers = #tpu.dot_dimension_numbers<[1], [0], [0], [1], [0, 0, 1, 1], [], []>} : vector<8x128xbf16>, vector<128x128xbf16>, vector<8x128xf32> -> vector<8x128xf32>
    %15 = vector.broadcast %5 : vector<1x128xf32> to vector<8x128xf32>
    %16 = arith.addf %14, %15 : vector<8x128xf32>
    %cst_11 = arith.constant 0.000000e+00 : f32
    %17 = vector.broadcast %cst_11 : f32 to vector<8x128xf32>
    %18 = arith.maximumf %16, %17 : vector<8x128xf32>
    %19 = vector.broadcast %7 : vector<1x128xf32> to vector<8x128xf32>
    %20 = arith.mulf %18, %19 : vector<8x128xf32>
    %cst_12 = arith.constant dense<0.000000e+00> : vector<8xf32>
    %21 = vector.multi_reduction <add>, %20, %cst_12 [1] : vector<8x128xf32> to vector<8xf32>
    %22 = vector.shape_cast %21 : vector<8xf32> to vector<8x1xf32>
    %23 = vector.broadcast %6 : vector<1x1xf32> to vector<8x1xf32>
    %24 = arith.addf %22, %23 : vector<8x1xf32>
    %c0_13 = arith.constant 0 : index
    %c0_14 = arith.constant 0 : index
    %25 = vector.load %arg4[%c0_13, %c0_14] : memref<8x1xf32, #tpu.memory_space<vmem>>, vector<8x1xf32>
    tpu.vector_store %arg4[%c0_13, %c0_14], %24 {strides = array<i32>} : memref<8x1xf32, #tpu.memory_space<vmem>>, vector<8x1xf32>,
    return
  }
  func.func @transform_0(%arg0: i32) -> (i32, i32) {
    %c0_i32 = arith.constant 0 : i32
    %c0_i32_0 = arith.constant 0 : i32
    return %arg0, %c0_i32 : i32, i32
  }
  func.func @transform_1(%arg0: i32) -> (i32, i32) {
    %c0_i32 = arith.constant 0 : i32
    %c0_i32_0 = arith.constant 0 : i32
    %c0_i32_1 = arith.constant 0 : i32
    return %c0_i32, %c0_i32_0 : i32, i32
  }
  func.func @transform_2(%arg0: i32) -> (i32, i32) {
    %c0_i32 = arith.constant 0 : i32
    %c0_i32_0 = arith.constant 0 : i32
    %c0_i32_1 = arith.constant 0 : i32
    return %c0_i32, %c0_i32_0 : i32, i32
  }
  func.func @transform_3(%arg0: i32) -> (i32, i32) {
    %c0_i32 = arith.constant 0 : i32
    %c0_i32_0 = arith.constant 0 : i32
    return %arg0, %c0_i32 : i32, i32
  }
}

</mosaic_0001>

<bundles_post_ra>
// kernel: critic_forward.1
= control target key start
LH: loop header
LB: loop body
LE: loop exit
PB: predicated region body
PF: predicated region fallthrough
CT: control target
= control target key end

     0   :  { %8 = vsyncpa [#allocation3], 0  ;;  %s461_s0 = inlined_call_operand.hbm [shape: f32[8,32], index: 0, kind: input, shape index: {}]   ;;  %s462_s1 = inlined_call_operand.hbm [shape: bf16[160,128], index: 1, kind: input, shape index: {}]   ;;  %s463_s2 = inlined_call_operand.hbm [shape: f32[8,128], index: 2, kind: input, shape index: {}]   ;;  %s464_s3 = inlined_call_operand.vmem [shape: f32[8,1], index: 3, kind: output, shape index: {}]  }
   0x1   :  { %9 = vsyncpa [#allocation5], 0  ;;  %s395_s12 = smov [#allocation4]   ;;  %s325_s16 = scalar_lea.hbm %s462_s1, 1280 }
   0x2   :  { %s25_s13 = sshll.u32 %s395_s12, 4  ;;  %p326_p0 = scmp.ne.s32.totalorder %s462_s1, %s325_s16  ;;  %s26_s13 = int_to_ptr.vmem [resolvable:$true] %s25_s13 }
   0x3   :  { %p329_p1 = scmp.lt.u32.totalorder %s325_s16, %s462_s1 }
   0x5   :  { %p331_p2 = pnand %p329_p1, %p326_p0 }
   0x7   :  { %334 = shalt.err (!%p331_p2)
}
   0x8   :  { %s335_s21 = scalar_lea.vmem %s26_s13, 1280  ;;  %p340_p4 = scmp.lt.s32.totalorder %s26_s13, %s26_s13 }
   0x9   :  { %p336_p3 = scmp.ne.s32.totalorder %s26_s13, %s335_s21  ;;  %p341_p5 = scmp.lt.s32.totalorder %s335_s21, %s335_s21 }
   0xb   :  { %p342_p6 = por %p341_p5, %p340_p4 }
   0xd   :  { %p343_p7 = pnand %p342_p6, %p336_p3 }
   0xf   :  { %346 = shalt.err (!%p343_p7)
}
  0x10   :  { %s396_s22 = smov 64   ;;  %s397_s23 = smov 4  }
  0x11   :  { %31 = dma.hbm_to_vmem [thread:$0]  %s462_s1, 1280, %s26_s13, [#allocation5], %s396_s22, %s396_s22, %s397_s23  }
  0x12   :  { %s398_s26 = smov [#allocation2]   ;;  %s399_s28 = smov [#allocation6]  }
  0x13   :  { %s16_s27 = sshll.u32 %s398_s26, 4  ;;  %s38_s29 = sshll.u32 %s399_s28, 4  ;;  %s17_s27 = int_to_ptr.vmem [resolvable:$true] %s16_s27  ;;  %s39_s29 = int_to_ptr.vmem [resolvable:$true] %s38_s29 }
  0x14   :  { %s347_s5 = scalar_lea.hbm %s461_s0, 128 }
  0x15   :  { %p348_p8 = scmp.ne.s32.totalorder %s461_s0, %s347_s5  ;;  %p351_p9 = scmp.lt.u32.totalorder %s347_s5, %s461_s0 }
  0x17   :  { %p353_p10 = pnand %p351_p9, %p348_p8 }
  0x19   :  { %356 = shalt.err (!%p353_p10)
}
  0x1a   :  { %s357_s1 = scalar_lea.vmem %s17_s27, 128  ;;  %p362_p12 = scmp.lt.s32.totalorder %s17_s27, %s17_s27 }
  0x1b   :  { %p358_p11 = scmp.ne.s32.totalorder %s17_s27, %s357_s1  ;;  %p363_p13 = scmp.lt.s32.totalorder %s357_s1, %s357_s1 }
  0x1d   :  { %p364_p0 = por %p363_p13, %p362_p12 }
  0x1f   :  { %p365_p1 = pnand %p364_p0, %p358_p11 }
  0x21   :  { %368 = shalt.err (!%p365_p1)
}
  0x22   :  { %19 = dma.hbm_to_vmem [thread:$0]  %s461_s0, 128, %s17_s27, [#allocation3]  }
  0x23   :  { %s369_s14 = scalar_lea.hbm %s463_s2, 128 }
  0x24   :  { %p370_p2 = scmp.ne.s32.totalorder %s463_s2, %s369_s14  ;;  %p373_p3 = scmp.lt.u32.totalorder %s369_s14, %s463_s2 }
  0x26   :  { %p375_p4 = pnand %p373_p3, %p370_p2 }
  0x28   :  { %378 = shalt.err (!%p375_p4)
}
  0x29   :  { %s379_s19 = scalar_lea.vmem %s39_s29, 128  ;;  %p384_p6 = scmp.lt.s32.totalorder %s39_s29, %s39_s29 }
  0x2a   :  { %p380_p5 = scmp.ne.s32.totalorder %s39_s29, %s379_s19  ;;  %p385_p7 = scmp.lt.s32.totalorder %s379_s19, %s379_s19 }
  0x2c   :  { %p386_p8 = por %p385_p7, %p384_p6 }
  0x2e   :  { %p387_p9 = pnand %p386_p8, %p380_p5 }
  0x30   :  { %390 = shalt.err (!%p387_p9)
}
  0x31   :  { %41 = dma.hbm_to_vmem [thread:$0]  %s463_s2, 128, %s39_s29, [#allocation5]  }
  0x32   :  { %391 = dma.done.wait [#allocation3], 128  }
  0x33   :  { %392 = vsyncadd [#allocation3], 4294967168 }
  0x34   :  { %393 = dma.done.wait [#allocation5], 1408  }
  0x35   :  { %394 = vsyncadd [#allocation5], 4294965888  ;;  %v400_v0 = vmov 0.0   ;;  %vm401_vm0 = vmmov 0   ;;  %v315_v1 = vld [vmem:[#allocation4] sm:$0xff]   ;;  %v316_v2 = vld [vmem:[#allocation4 + $0x8] sm:$0xff]  }
  0x36   :  { %280 = vmatprep.subr.bf16.mxu0 %v400_v0  ;;  %284 = vmatprep.mubr.msk.bf16.mxu0 %vm401_vm0, %v400_v0  ;;  %v52_v3 = vld [vmem:[#allocation2] sm:$0xff]  ;;  %v317_v4 = vld [vmem:[#allocation4 + $0x10] sm:$0xff]   ;;  %vm94_vm1 = vcmask 261120   ;;  %v319_v7 = vld [vmem:[#allocation4 + $0x20] sm:$0xff]   ;;  %vm245_vm2 = vcmask 7168  }
  0x37   :  { %288 = vmatprep.subr.bf16.mxu1 %v400_v0  ;;  %304 = vmatprep.mubr.msk.bf16.mxu1 %vm401_vm0, %v400_v0  ;;  %v53_v5 = vpack.c.bf16 %v52_v3, %v52_v3  ;;  %v318_v6 = vld [vmem:[#allocation4 + $0x18] sm:$0xff]   ;;  %v320_v8 = vld [vmem:[#allocation4 + $0x28] sm:$0xff]   ;;  %v321_v9 = vld [vmem:[#allocation4 + $0x30] sm:$0xff]  }
  0x38   :  { %281 = vmatpush3.bf16.msra.mxu0 %v315_v1  ;;  %289 = vmatpush3.bf16.msra.mxu1 %v317_v4  ;;  %v322_v10 = vld [vmem:[#allocation4 + $0x38] sm:$0xff]   ;;  %v323_v11 = vld [vmem:[#allocation4 + $0x40] sm:$0xff]   ;;  %v324_v12 = vld [vmem:[#allocation4 + $0x48] sm:$0xff]  }
  0x39   :  { %282 = vmatprep.subr.bf16.mxu0 %v400_v0  ;;  %290 = vmatprep.subr.bf16.mxu1 %v400_v0  ;;  %v253_v13 = vld [vmem:[#allocation6] ss:$0 sm:$0xff]  ;;  %v257_v21 = vld [vmem:[#allocation6 + $0x1] ss:$0 sm:$0xff]  ;;  %v266_v26 = vld [vmem:[#allocation6 + $0x3] ss:$0 sm:$0xff] }
  0x3a   :  { %v267_v30 = vld [vmem:[#allocation6 + $0x2] ss:$0 sm:$0xff] }
  0x3c   :  { %283 = vmatpush3.bf16.msra.mxu0 %v316_v2  ;;  %291 = vmatpush3.bf16.msra.mxu1 %v318_v6 }
  0x3d   :  { %292 = vmatprep.subr.bf16.mxu1 %v400_v0 }
  0x3f   :  { %285 = vmatmul.mubr.msk.bf16.vlgmr.msra.gmra.mrb[0].mxu0 %vm94_vm1, %v53_v5 }
  0x40   :  { %293 = vmatpush3.bf16.msra.mxu1 %v319_v7 }
  0x41   :  { %294 = vmatprep.subr.bf16.mxu1 %v400_v0 }
  0x44   :  { %295 = vmatpush3.bf16.msra.mxu1 %v320_v8 }
  0x45   :  { %296 = vmatprep.subr.bf16.mxu1 %v400_v0 }
  0x48   :  { %297 = vmatpush3.bf16.msra.mxu1 %v321_v9 }
  0x49   :  { %298 = vmatprep.subr.bf16.mxu1 %v400_v0 }
  0x4c   :  { %299 = vmatpush3.bf16.msra.mxu1 %v322_v10 }
  0x4d   :  { %300 = vmatprep.subr.bf16.mxu1 %v400_v0 }
  0x50   :  { %301 = vmatpush3.bf16.msra.mxu1 %v323_v11 }
  0x51   :  { %302 = vmatprep.subr.bf16.mxu1 %v400_v0 }
  0x54   :  { %303 = vmatpush3.bf16.msra.mxu1 %v324_v12 }
 0x112   :  { %v132_v14 = vpop.f32.mrb[0].mxu0 }
 0x113   :  { %v133_v15 = vadd.f32 %v253_v13, %v132_v14  ;;  %v286_v16 = vpop.f32.mrb[1].mxu0 }
 0x114   :  { %v135_v17 = vpop.f32.mrb[2].mxu0 }
 0x115   :  { %v138_v18 = vmax.f32 %v133_v15, 0.0  ;;  %v287_v19 = vpop.f32.mrb[3].mxu0 }
 0x117   :  { %v139_v20 = vpack.c.bf16 %v138_v18, %v138_v18 }
 0x119   :  { %305 = vmatmul.mubr.bf16.vlgmr.msra.gmra.mrb[0].mxu1 %v139_v20 }
 0x1ec   :  { %v226_v22 = vpop.f32.mrb[0].mxu1 }
 0x1ed   :  { %v227_v23 = vadd.f32 %v257_v21, %v226_v22  ;;  %v306_v24 = vpop.f32.mrb[1].mxu1 }
 0x1ee   :  { %v229_v25 = vpop.f32.mrb[2].mxu1 }
 0x1ef   :  { %v232_v27 = vmax.f32 %v227_v23, 0.0  ;;  %v307_v28 = vpop.f32.mrb[3].mxu1 }
 0x1f1   :  { %v237_v29 = vmul.f32 %v266_v26, %v232_v27 }
 0x1f3   :  { %238 = vadd.xlane.f32.xlu0 %v237_v29 }
 0x280   :  { %v239_v31 = vpop.xlane.xlu0 %238 }
 0x281   :  { %v244_v32 = vadd.f32 %v267_v30, %v239_v31 }
 0x283   :  { %246 = vst.msk [vmem:[%s464_s3] sm:$0xff] %vm245_vm2, %v244_v32 }
 0x284   :  { %251 = vsyncpa [#allocation3], 1 }
 0x285   :  { %252 = vsyncpa [#allocation5], 1 }

</bundles_post_ra>
